<compile_context>
chip_gen: v7x
topology: tpu7x:2x2x1
jax: 0.10.0
libtpu: 0.0.40
codegen_flags: <defaults>
</compile_context>

<pallas_src>
import jax
import jax.numpy as jnp
from jax.experimental import pallas as pl
from jax.experimental.pallas import tpu as pltpu

_LANES = 128
_TARGET_TILE_ROWS = 1024  # (1024, 128) f32 tile = 512 KiB


def _num_core_splits():
    """2 on v7x (2 TensorCores per chip), else 1. Falls back to 1 on any doubt."""
    try:
        kind = jax.devices()[0].device_kind.lower()
    except Exception:
        return 1
    if "v7" in kind or "7x" in kind:
        return 2
    return 1


def _make_kernel(tile_rows, lanes, rows_valid, tiles_per_split, needs_mask):
    def kernel(old_ref, new_ref, orig_ref, out_yx_ref, out_xx_ref,
               acc_yx_ref, acc_xx_ref):
        c = pl.program_id(0)   # core split (parallel)
        t = pl.program_id(1)   # streamed reduction step (arbitrary)

        @pl.when(t == 0)
        def _init():
            acc_yx_ref[...] = jnp.zeros_like(acc_yx_ref)
            acc_xx_ref[...] = jnp.zeros_like(acc_xx_ref)

        # Upcast in-kernel (inputs ship in their native dtype, e.g. bf16).
        orig = orig_ref[...].astype(jnp.float32)
        dx = old_ref[...].astype(jnp.float32) - orig   # x chunk
        dy = new_ref[...].astype(jnp.float32) - orig   # y chunk

        if needs_mask:
            # Zero out rows past the end of the (logically flat) input.  The
            # comparison uses the *logical* tile index, so clamped / partial
            # last blocks contribute exactly zero.
            row0 = (c * tiles_per_split + t) * tile_rows
            rid = row0 + jax.lax.broadcasted_iota(jnp.int32, (tile_rows, lanes), 0)
            valid = rid < rows_valid
            dx = jnp.where(valid, dx, 0.0)
            dy = jnp.where(valid, dy, 0.0)

        # Pure-VPU elementwise accumulate; the cross-lane reduction is deferred
        # to a single tiny jnp.sum over the partial outputs in the wrapper.
        acc_yx_ref[...] += dy * dx
        acc_xx_ref[...] += dx * dx

        @pl.when(t == pl.num_programs(1) - 1)
        def _finalize():
            out_yx_ref[0] = acc_yx_ref[...]
            out_xx_ref[0] = acc_xx_ref[...]

    return kernel


def proj_loss(old_attack_mid, new_mid, original_mid, coeff=None):
    """Pallas equivalent of Proj_Loss.forward. `coeff` is unused (matches torch)."""
    del coeff  # not used in the reference forward pass

    n = old_attack_mid.size
    lane_pad = (-n) % _LANES

    def _as_rows(a):
        # Keep native dtype (upcast happens inside the kernel) and avoid copies:
        # ravel/reshape of a contiguous array is layout-preserving.
        a = jnp.ravel(a)
        if lane_pad:
            # Rare path: element count not a multiple of 128 lanes.  The zero
            # padding contributes 0 to both dot products -> exact semantics.
            a = jnp.pad(a, (0, lane_pad))
        return a.reshape(-1, _LANES)

    old2d = _as_rows(old_attack_mid)
    new2d = _as_rows(new_mid)
    orig2d = _as_rows(original_mid)

    rows = old2d.shape[0]
    if rows >= 8:
        tile_rows = min(_TARGET_TILE_ROWS, (rows // 8) * 8)
    else:
        tile_rows = rows  # tiny input: single full-extent block

    total_tiles = (rows + tile_rows - 1) // tile_rows
    num_splits = max(1, min(_num_core_splits(), total_tiles))
    tiles_per_split = (total_tiles + num_splits - 1) // num_splits
    covered_rows = num_splits * tiles_per_split * tile_rows
    needs_mask = covered_rows != rows
    needs_clamp = num_splits * tiles_per_split != total_tiles

    if needs_clamp:
        def in_map(c, t):
            # Keep the DMA in bounds; the row mask zeroes the duplicate read.
            return (jnp.minimum(c * tiles_per_split + t, total_tiles - 1), 0)
    else:
        def in_map(c, t):
            return (c * tiles_per_split + t, 0)

    in_spec = pl.BlockSpec((tile_rows, _LANES), in_map)
    out_spec = pl.BlockSpec((1, tile_rows, _LANES), lambda c, t: (c, 0, 0))
    partial_shape = jax.ShapeDtypeStruct((num_splits, tile_rows, _LANES),
                                         jnp.float32)

    kernel = _make_kernel(tile_rows, _LANES, rows, tiles_per_split, needs_mask)

    out_yx, out_xx = pl.pallas_call(
        kernel,
        out_shape=(partial_shape, partial_shape),
        grid_spec=pltpu.PrefetchScalarGridSpec(
            num_scalar_prefetch=0,
            grid=(num_splits, tiles_per_split),
            in_specs=[in_spec, in_spec, in_spec],
            out_specs=[out_spec, out_spec],
            scratch_shapes=[
                pltpu.VMEM((tile_rows, _LANES), jnp.float32),
                pltpu.VMEM((tile_rows, _LANES), jnp.float32),
            ],
        ),
        compiler_params=pltpu.CompilerParams(
            dimension_semantics=("parallel", "arbitrary"),
        ),
    )(old2d, new2d, orig2d)

    # <y, x> / <x, x>  ==  mm(y, x_norm.T) / ||x||  in the torch reference.
    s_yx = jnp.sum(out_yx)
    s_xx = jnp.sum(out_xx)
    return (s_yx / s_xx).reshape(1, 1)


def _reference(old_attack_mid, new_mid, original_mid):
    x = (old_attack_mid - original_mid).reshape(1, -1).astype(jnp.float32)
    y = (new_mid - original_mid).reshape(1, -1).astype(jnp.float32)
    xn = jnp.linalg.norm(x)
    return (y @ (x / xn).T) / xn


if __name__ == "__main__":
    key = jax.random.PRNGKey(0)
    k1, k2, k3 = jax.random.split(key, 3)

    # mid-layer feature maps, NCHW (matches the torch module's expected inputs)
    shape = (2, 4, 16, 16)
    old_attack_mid = jax.random.normal(k1, shape, dtype=jnp.float32)
    new_mid = jax.random.normal(k2, shape, dtype=jnp.float32)
    original_mid = jax.random.normal(k3, shape, dtype=jnp.float32)
    coeff = 1.0  # unused by the forward pass (matches the torch module)

    out = proj_loss(old_attack_mid, new_mid, original_mid, coeff)
    out = jax.block_until_ready(out)

    ref = _reference(old_attack_mid, new_mid, original_mid)
    assert out.shape == (1, 1)
    assert jnp.allclose(out, ref, rtol=1e-5, atol=1e-6), (out, ref)
    print("KERNEL_OK")
</pallas_src>

<mosaic_0001>
module attributes {stable_mosaic.version = 11 : i64} {
  func.func @kernel(%arg0: i32, %arg1: i32, %arg2: memref<16x128xf32, #tpu.memory_space<vmem>>, %arg3: memref<16x128xf32, #tpu.memory_space<vmem>>, %arg4: memref<16x128xf32, #tpu.memory_space<vmem>>, %arg5: memref<1x16x128xf32, #tpu.memory_space<vmem>>, %arg6: memref<1x16x128xf32, #tpu.memory_space<vmem>>, %arg7: memref<16x128xf32, #tpu.memory_space<vmem>>, %arg8: memref<16x128xf32, #tpu.memory_space<vmem>>) attributes {dimension_semantics = [#tpu.dimension_semantics<parallel>, #tpu.dimension_semantics<arbitrary>], iteration_bounds = array<i64: 1, 1>, scalar_prefetch = 0 : i64, scratch_operands = 2 : i64, tpu.core_type = #tpu.core_type<tc>, window_params = [{transform_indices = @transform_0, window_bounds = array<i64: 16, 128>}, {transform_indices = @transform_1, window_bounds = array<i64: 16, 128>}, {transform_indices = @transform_2, window_bounds = array<i64: 16, 128>}, {transform_indices = @transform_3, window_bounds = array<i64: 1, 16, 128>}, {transform_indices = @transform_4, window_bounds = array<i64: 1, 16, 128>}]} {
    %c0_i32 = arith.constant 0 : i32
    %0 = arith.cmpi eq, %arg1, %c0_i32 : i32
    %1 = arith.extui %0 : i1 to i32
    %c0_i32_0 = arith.constant 0 : i32
    %2 = arith.cmpi ne, %1, %c0_i32_0 : i32
    scf.if %2 {
      %cst = arith.constant 0.000000e+00 : f32
      %19 = vector.broadcast %cst : f32 to vector<16x128xf32>
      %c0_16 = arith.constant 0 : index
      %c0_17 = arith.constant 0 : index
      %20 = vector.load %arg7[%c0_16, %c0_17] : memref<16x128xf32, #tpu.memory_space<vmem>>, vector<16x128xf32>
      tpu.vector_store %arg7[%c0_16, %c0_17], %19 {strides = array<i32>} : memref<16x128xf32, #tpu.memory_space<vmem>>, vector<16x128xf32>,
      %cst_18 = arith.constant 0.000000e+00 : f32
      %21 = vector.broadcast %cst_18 : f32 to vector<16x128xf32>
      %c0_19 = arith.constant 0 : index
      %c0_20 = arith.constant 0 : index
      %22 = vector.load %arg8[%c0_19, %c0_20] : memref<16x128xf32, #tpu.memory_space<vmem>>, vector<16x128xf32>
      tpu.vector_store %arg8[%c0_19, %c0_20], %21 {strides = array<i32>} : memref<16x128xf32, #tpu.memory_space<vmem>>, vector<16x128xf32>,
    } else {
    }
    %c0 = arith.constant 0 : index
    %c0_1 = arith.constant 0 : index
    %3 = vector.load %arg4[%c0, %c0_1] : memref<16x128xf32, #tpu.memory_space<vmem>>, vector<16x128xf32>
    %c0_2 = arith.constant 0 : index
    %c0_3 = arith.constant 0 : index
    %4 = vector.load %arg2[%c0_2, %c0_3] : memref<16x128xf32, #tpu.memory_space<vmem>>, vector<16x128xf32>
    %5 = arith.subf %4, %3 : vector<16x128xf32>
    %c0_4 = arith.constant 0 : index
    %c0_5 = arith.constant 0 : index
    %6 = vector.load %arg3[%c0_4, %c0_5] : memref<16x128xf32, #tpu.memory_space<vmem>>, vector<16x128xf32>
    %7 = arith.subf %6, %3 : vector<16x128xf32>
    %c0_6 = arith.constant 0 : index
    %c0_7 = arith.constant 0 : index
    %8 = vector.load %arg7[%c0_6, %c0_7] : memref<16x128xf32, #tpu.memory_space<vmem>>, vector<16x128xf32>
    %9 = arith.mulf %7, %5 : vector<16x128xf32>
    %10 = arith.addf %8, %9 : vector<16x128xf32>
    %c0_8 = arith.constant 0 : index
    %c0_9 = arith.constant 0 : index
    %11 = vector.load %arg7[%c0_8, %c0_9] : memref<16x128xf32, #tpu.memory_space<vmem>>, vector<16x128xf32>
    tpu.vector_store %arg7[%c0_8, %c0_9], %10 {strides = array<i32>} : memref<16x128xf32, #tpu.memory_space<vmem>>, vector<16x128xf32>,
    %c0_10 = arith.constant 0 : index
    %c0_11 = arith.constant 0 : index
    %12 = vector.load %arg8[%c0_10, %c0_11] : memref<16x128xf32, #tpu.memory_space<vmem>>, vector<16x128xf32>
    %13 = arith.mulf %5, %5 : vector<16x128xf32>
    %14 = arith.addf %12, %13 : vector<16x128xf32>
    %c0_12 = arith.constant 0 : index
    %c0_13 = arith.constant 0 : index
    %15 = vector.load %arg8[%c0_12, %c0_13] : memref<16x128xf32, #tpu.memory_space<vmem>>, vector<16x128xf32>
    tpu.vector_store %arg8[%c0_12, %c0_13], %14 {strides = array<i32>} : memref<16x128xf32, #tpu.memory_space<vmem>>, vector<16x128xf32>,
    %c0_i32_14 = arith.constant 0 : i32
    %16 = arith.cmpi eq, %arg1, %c0_i32_14 : i32
    %17 = arith.extui %16 : i1 to i32
    %c0_i32_15 = arith.constant 0 : i32
    %18 = arith.cmpi ne, %17, %c0_i32_15 : i32
    scf.if %18 {
      %c0_16 = arith.constant 0 : index
      %c0_17 = arith.constant 0 : index
      %19 = vector.load %arg7[%c0_16, %c0_17] : memref<16x128xf32, #tpu.memory_space<vmem>>, vector<16x128xf32>
      %c0_18 = arith.constant 0 : index
      %c0_19 = arith.constant 0 : index
      %c0_20 = arith.constant 0 : index
      %20 = vector.load %arg5[%c0_18, %c0_19, %c0_20] : memref<1x16x128xf32, #tpu.memory_space<vmem>>, vector<1x16x128xf32>
      %21 = vector.shape_cast %20 : vector<1x16x128xf32> to vector<16x128xf32>
      %22 = vector.shape_cast %19 : vector<16x128xf32> to vector<1x16x128xf32>
      tpu.vector_store %arg5[%c0_18, %c0_19, %c0_20], %22 {strides = array<i32>} : memref<1x16x128xf32, #tpu.memory_space<vmem>>, vector<1x16x128xf32>,
      %c0_21 = arith.constant 0 : index
      %c0_22 = arith.constant 0 : index
      %23 = vector.load %arg8[%c0_21, %c0_22] : memref<16x128xf32, #tpu.memory_space<vmem>>, vector<16x128xf32>
      %c0_23 = arith.constant 0 : index
      %c0_24 = arith.constant 0 : index
      %c0_25 = arith.constant 0 : index
      %24 = vector.load %arg6[%c0_23, %c0_24, %c0_25] : memref<1x16x128xf32, #tpu.memory_space<vmem>>, vector<1x16x128xf32>
      %25 = vector.shape_cast %24 : vector<1x16x128xf32> to vector<16x128xf32>
      %26 = vector.shape_cast %23 : vector<16x128xf32> to vector<1x16x128xf32>
      tpu.vector_store %arg6[%c0_23, %c0_24, %c0_25], %26 {strides = array<i32>} : memref<1x16x128xf32, #tpu.memory_space<vmem>>, vector<1x16x128xf32>,
    } else {
    }
    return
  }
  func.func @transform_0(%arg0: i32, %arg1: i32) -> (i32, i32) {
    %c1_i32 = arith.constant 1 : i32
    %0 = arith.muli %arg0, %c1_i32 : i32
    %1 = arith.addi %0, %arg1 : i32
    %c0_i32 = arith.constant 0 : i32
    %c0_i32_0 = arith.constant 0 : i32
    return %1, %c0_i32 : i32, i32
  }
  func.func @transform_1(%arg0: i32, %arg1: i32) -> (i32, i32) {
    %c1_i32 = arith.constant 1 : i32
    %0 = arith.muli %arg0, %c1_i32 : i32
    %1 = arith.addi %0, %arg1 : i32
    %c0_i32 = arith.constant 0 : i32
    %c0_i32_0 = arith.constant 0 : i32
    return %1, %c0_i32 : i32, i32
  }
  func.func @transform_2(%arg0: i32, %arg1: i32) -> (i32, i32) {
    %c1_i32 = arith.constant 1 : i32
    %0 = arith.muli %arg0, %c1_i32 : i32
    %1 = arith.addi %0, %arg1 : i32
    %c0_i32 = arith.constant 0 : i32
    %c0_i32_0 = arith.constant 0 : i32
    return %1, %c0_i32 : i32, i32
  }
  func.func @transform_3(%arg0: i32, %arg1: i32) -> (i32, i32, i32) {
    %c0_i32 = arith.constant 0 : i32
    %c0_i32_0 = arith.constant 0 : i32
    %c0_i32_1 = arith.constant 0 : i32
    return %arg0, %c0_i32, %c0_i32_0 : i32, i32, i32
  }
  func.func @transform_4(%arg0: i32, %arg1: i32) -> (i32, i32, i32) {
    %c0_i32 = arith.constant 0 : i32
    %c0_i32_0 = arith.constant 0 : i32
    %c0_i32_1 = arith.constant 0 : i32
    return %arg0, %c0_i32, %c0_i32_0 : i32, i32, i32
  }
}

</mosaic_0001>

<bundles_post_ra>
// kernel: tpu_custom_call.1
= control target key start
LH: loop header
LB: loop body
LE: loop exit
PB: predicated region body
PF: predicated region fallthrough
CT: control target
= control target key end

     0   :  { %10 = vsyncpa [#allocation5], 0  ;;  %s402_s0 = inlined_call_operand.hbm [shape: f32[16,128], index: 0, kind: input, shape index: {}]   ;;  %s403_s1 = inlined_call_operand.hbm [shape: f32[16,128], index: 1, kind: input, shape index: {}]   ;;  %s404_s2 = inlined_call_operand.hbm [shape: f32[16,128], index: 2, kind: input, shape index: {}]   ;;  %s405_s3 = inlined_call_operand.hbm [shape: f32[1,16,128], index: 3, kind: output, shape index: {0}]   ;;  %s406_s4 = inlined_call_operand.hbm [shape: f32[1,16,128], index: 4, kind: output, shape index: {1}]  }
   0x1   :  { %11 = vsyncpa [#allocation8], 0 }
   0x2   :  { %12 = vsyncpa [#allocation6], 0 }
   0x3   :  { %13 = vsyncpa [#allocation12], 0  ;;  %s281_s15 = smov [#allocation7]   ;;  %s282_s17 = smov [#allocation4]  }
   0x4   :  { %s39_s16 = sshll.u32 %s281_s15, 4  ;;  %s23_s18 = sshll.u32 %s282_s17, 4  ;;  %s40_s16 = int_to_ptr.vmem [resolvable:$true] %s39_s16  ;;  %s313_s18 = int_to_ptr.vmem [resolvable:$true] %s23_s18 }
   0x5   :  { %s163_s21 = scalar_lea.hbm %s403_s1, 256 }
   0x6   :  { %p164_p0 = scmp.ne.s32.totalorder %s403_s1, %s163_s21  ;;  %p167_p1 = scmp.lt.u32.totalorder %s163_s21, %s403_s1 }
   0x8   :  { %p169_p2 = pnand %p167_p1, %p164_p0 }
   0xa   :  { %172 = shalt.err (!%p169_p2)
}
   0xb   :  { %s173_s26 = scalar_lea.vmem %s40_s16, 256  ;;  %p178_p4 = scmp.lt.s32.totalorder %s40_s16, %s40_s16 }
   0xc   :  { %p174_p3 = scmp.ne.s32.totalorder %s40_s16, %s173_s26  ;;  %p179_p5 = scmp.lt.s32.totalorder %s173_s26, %s173_s26 }
   0xe   :  { %p180_p6 = por %p179_p5, %p178_p4 }
  0x10   :  { %p181_p7 = pnand %p180_p6, %p174_p3 }
  0x12   :  { %184 = shalt.err (!%p181_p7)
}
  0x13   :  { %s283_s27 = smov 128   ;;  %s284_s28 = smov 8  }
  0x14   :  { %45 = dma.hbm_to_vmem [thread:$0]  %s403_s1, 256, %s40_s16, [#allocation8], %s283_s27, %s283_s27, %s284_s28  }
  0x15   :  { %s185_s7 = scalar_lea.hbm %s402_s0, 256 }
  0x16   :  { %p186_p8 = scmp.ne.s32.totalorder %s402_s0, %s185_s7  ;;  %p189_p9 = scmp.lt.u32.totalorder %s185_s7, %s402_s0 }
  0x18   :  { %p191_p10 = pnand %p189_p9, %p186_p8 }
  0x1a   :  { %194 = shalt.err (!%p191_p10)
}
  0x1b   :  { %s195_s12 = scalar_lea.vmem %s313_s18, 256  ;;  %p200_p12 = scmp.lt.s32.totalorder %s313_s18, %s313_s18 }
  0x1c   :  { %p196_p11 = scmp.ne.s32.totalorder %s313_s18, %s195_s12  ;;  %p201_p13 = scmp.lt.s32.totalorder %s195_s12, %s195_s12 }
  0x1e   :  { %p202_p0 = por %p201_p13, %p200_p12 }
  0x20   :  { %p203_p1 = pnand %p202_p0, %p196_p11 }
  0x22   :  { %206 = shalt.err (!%p203_p1)
}
  0x23   :  { %29 = dma.hbm_to_vmem [thread:$0]  %s402_s0, 256, %s313_s18, [#allocation5], %s283_s27, %s283_s27, %s284_s28  }
  0x24   :  { %s285_s14 = smov [#allocation9]   ;;  %s207_s19 = scalar_lea.hbm %s404_s2, 256 }
  0x25   :  { %s55_s15 = sshll.u32 %s285_s14, 4  ;;  %p208_p2 = scmp.ne.s32.totalorder %s404_s2, %s207_s19  ;;  %s56_s15 = int_to_ptr.vmem [resolvable:$true] %s55_s15 }
  0x26   :  { %p211_p3 = scmp.lt.u32.totalorder %s207_s19, %s404_s2 }
  0x28   :  { %p213_p4 = pnand %p211_p3, %p208_p2 }
  0x2a   :  { %216 = shalt.err (!%p213_p4)
}
  0x2b   :  { %s217_s24 = scalar_lea.vmem %s56_s15, 256  ;;  %p222_p6 = scmp.lt.s32.totalorder %s56_s15, %s56_s15 }
  0x2c   :  { %p218_p5 = scmp.ne.s32.totalorder %s56_s15, %s217_s24  ;;  %p223_p7 = scmp.lt.s32.totalorder %s217_s24, %s217_s24 }
  0x2e   :  { %p224_p8 = por %p223_p7, %p222_p6 }
  0x30   :  { %p225_p9 = pnand %p224_p8, %p218_p5 }
  0x32   :  { %228 = shalt.err (!%p225_p9)
}
  0x33   :  { %61 = dma.hbm_to_vmem [thread:$0]  %s404_s2, 256, %s56_s15, [#allocation8], %s283_s27, %s283_s27, %s284_s28  }
  0x34   :  { %273 = dma.done.wait [#allocation5], 256  }
  0x35   :  { %274 = vsyncadd [#allocation5], 4294967040 }
  0x36   :  { %275 = dma.done.wait [#allocation8], 512  }
  0x37   :  { %276 = vsyncadd [#allocation8], 4294966784  ;;  %v85_v0 = vld [vmem:[#allocation9] sm:$0xff]  ;;  %v91_v2 = vld [vmem:[#allocation7] sm:$0xff]  ;;  %s286_s25 = smov [#allocation10]   ;;  %s287_s29 = smov [#allocation11]  }
  0x38   :  { %v87_v1 = vld [vmem:[#allocation4] sm:$0xff]  ;;  %v93_v4 = vsub.f32 %v91_v2, %v85_v0  ;;  %v86_v5 = vld [vmem:[#allocation9 + $0x8] sm:$0xff]  ;;  %v92_v7 = vld [vmem:[#allocation7 + $0x8] sm:$0xff]  ;;  %s127_s26 = sshll.u32 %s286_s25, 4  ;;  %s139_s30 = sshll.u32 %s287_s29, 4  ;;  %s128_s26 = int_to_ptr.vmem [resolvable:$true] %s127_s26  ;;  %s365_s30 = int_to_ptr.vmem [resolvable:$true] %s139_s30 }
  0x39   :  { %v89_v3 = vsub.f32 %v87_v1, %v85_v0  ;;  %v88_v6 = vld [vmem:[#allocation4 + $0x8] sm:$0xff]  ;;  %v94_v9 = vsub.f32 %v92_v7, %v86_v5  ;;  %s229_s2 = scalar_lea.vmem %s128_s26, 256  ;;  %p234_p11 = scmp.lt.s32.totalorder %s128_s26, %s128_s26 }
  0x3a   :  { %v90_v8 = vsub.f32 %v88_v6, %v86_v5  ;;  %p230_p10 = scmp.ne.s32.totalorder %s128_s26, %s229_s2  ;;  %p235_p12 = scmp.lt.s32.totalorder %s229_s2, %s229_s2 }
  0x3b   :  { %v97_v10 = vmul.f32 %v93_v4, %v89_v3  ;;  %v105_v11 = vmul.f32 %v89_v3, %v89_v3 }
  0x3c   :  { %v98_v12 = vmul.f32 %v94_v9, %v90_v8  ;;  %v106_v13 = vmul.f32 %v90_v8, %v90_v8  ;;  %p236_p13 = por %p235_p12, %p234_p11 }
  0x3d   :  { %116 = vst [vmem:[#allocation10] sm:$0xff] %v97_v10  ;;  %120 = vst [vmem:[#allocation11] sm:$0xff] %v105_v11 }
  0x3e   :  { %117 = vst [vmem:[#allocation10 + $0x8] sm:$0xff] %v98_v12  ;;  %121 = vst [vmem:[#allocation11 + $0x8] sm:$0xff] %v106_v13  ;;  %p237_p0 = pnand %p236_p13, %p230_p10 }
  0x40   :  { %240 = shalt.err (!%p237_p0)
}
  0x41   :  { %s241_s7 = scalar_lea.hbm %s405_s3, 256 }
  0x42   :  { %p242_p1 = scmp.ne.s32.totalorder %s405_s3, %s241_s7  ;;  %p245_p2 = scmp.lt.u32.totalorder %s241_s7, %s405_s3 }
  0x44   :  { %p247_p3 = pnand %p245_p2, %p242_p1 }
  0x46   :  { %250 = shalt.err (!%p247_p3)
}
  0x47   :  { %133 = dma.vmem_to_hbm [thread:$0]  %s128_s26, 256, %s405_s3, [#allocation6], %s283_s27, %s283_s27, %s284_s28  }
  0x48   :  { %s251_s13 = scalar_lea.vmem %s365_s30, 256  ;;  %p256_p5 = scmp.lt.s32.totalorder %s365_s30, %s365_s30 }
  0x49   :  { %p252_p4 = scmp.ne.s32.totalorder %s365_s30, %s251_s13  ;;  %p257_p6 = scmp.lt.s32.totalorder %s251_s13, %s251_s13 }
  0x4b   :  { %p258_p7 = por %p257_p6, %p256_p5 }
  0x4d   :  { %p259_p8 = pnand %p258_p7, %p252_p4 }
  0x4f   :  { %262 = shalt.err (!%p259_p8)
}
  0x50   :  { %s263_s16 = scalar_lea.hbm %s406_s4, 256 }
  0x51   :  { %p264_p9 = scmp.ne.s32.totalorder %s406_s4, %s263_s16  ;;  %p267_p10 = scmp.lt.u32.totalorder %s263_s16, %s406_s4 }
  0x53   :  { %p269_p11 = pnand %p267_p10, %p264_p9 }
  0x55   :  { %272 = shalt.err (!%p269_p11)
}
  0x56   :  { %145 = dma.vmem_to_hbm [thread:$0]  %s365_s30, 256, %s406_s4, [#allocation12], %s283_s27, %s283_s27, %s284_s28  }
  0x57   :  { %277 = dma.done.wait [#allocation6], 256  }
  0x58   :  { %278 = vsyncadd [#allocation6], 4294967040 }
  0x59   :  { %279 = dma.done.wait [#allocation12], 256  }
  0x5a   :  { %280 = vsyncadd [#allocation12], 4294967040 }
  0x5b   :  { %152 = vsyncpa [#allocation5], 1 }
  0x5c   :  { %153 = vsyncpa [#allocation8], 1 }
  0x5d   :  { %154 = vsyncpa [#allocation6], 1 }
  0x5e   :  { %155 = vsyncpa [#allocation12], 1 }

</bundles_post_ra>
